<compile_context>
chip_gen: v6e
topology: v6e:2x2x1
jax: 0.10.0
libtpu: 0.0.40
codegen_flags: <defaults>
</compile_context>

<pallas_src>
import jax
import jax.numpy as jnp
from jax import lax
from jax.experimental import pallas as pl
from jax.experimental.pallas import tpu as pltpu

NUM_CLS    = 3
VOCAB      = 100
VOCAB_PAD  = 128          # vocab padded to a full lane tile for the one-hot gather
PROJ       = 32           # proj_size == reduced_emb_size (emb_projection=True)
SEQ        = 8            # seq_len
NKER       = 4            # n_kernel
KHS        = (2, 3, 4)    # conv kernel heights, kw = 1 (architecture 'A')
HIDDEN     = 505          # forced by cnn_architecture == 'A'
HIDDEN_PAD = 512          # 4 clean 128-lane tiles
BATCH      = 2
LANES      = NKER * PROJ            # 128 = one conv's [channel, emb] block
FEAT       = len(KHS) * LANES       # 384 = 3 x 128
CONV_ROWS  = sum(KHS)               # 9 rows of lane-replicated conv weights
CONVW_PAD  = 16                     # conv-weight slab padded to (16, 128)
NEG        = -1e30                  # bias for padded head lanes -> exp() == 0


def _relu(x):
    return jnp.maximum(x, 0.0)


def fused_kernel(tok_ref, table_ref, convw_ref, bias_ref, wf_ref, wh_ref, out_ref):
    # ---- fused embedding gather + (pre-folded) projection: ONE bf16 MXU matmul ----
    tok = tok_ref[...]                                              # (B*S, 1) int32
    vocab_ids = lax.broadcasted_iota(jnp.int32, (BATCH * SEQ, VOCAB_PAD), 1)
    onehot = (vocab_ids == tok).astype(jnp.bfloat16)                # (16, 128), exact 0/1
    bp = bias_ref[0:1, 0:LANES]                                     # (1, 128)
    proj = _relu(jnp.dot(onehot, table_ref[...],
                         preferred_element_type=jnp.float32) + bp)  # (16, 128) f32
    proj3 = proj.reshape(BATCH, SEQ, LANES)                         # tile-aligned split

    # ---- convs (kw==1) vectorized over channels + relu + max-pool;
    #      dropout == identity.  Pooled (B,128) blocks concat lane-tile-wise. ----
    pooled = []
    row = 0
    for i, kh in enumerate(KHS):
        h_out = SEQ - kh + 1
        acc = proj3[:, 0:h_out, :] * convw_ref[row:row + 1, :]
        for dh in range(1, kh):
            acc = acc + proj3[:, dh:dh + h_out, :] * convw_ref[row + dh:row + dh + 1, :]
        row += kh
        acc = _relu(acc + bias_ref[1 + i:2 + i, 0:LANES])           # (B, h_out, 128)
        pooled.append(jnp.max(acc, axis=1))                         # (B, 128)
    feats = jnp.concatenate(pooled, axis=-1).astype(jnp.bfloat16)   # (B, 384)

    # ---- single k=384 final projection + relu ----
    bf = bias_ref[4:5, :]                                           # (1, 512)
    hidden = _relu(jnp.dot(feats, wf_ref[...],
                           preferred_element_type=jnp.float32) + bf)  # (B, 512)

    # ---- head + softmax; padded lanes carry -1e30 bias -> exp == 0 ----
    bh = bias_ref[5:6, 0:LANES]                                     # (1, 128)
    logits = jnp.dot(hidden.astype(jnp.bfloat16), wh_ref[...],
                     preferred_element_type=jnp.float32) + bh       # (B, 128)
    m = jnp.max(logits, axis=-1, keepdims=True)
    e = jnp.exp(logits - m)
    denom = jnp.sum(e, axis=-1, keepdims=True)
    out_ref[...] = e * pl.reciprocal(denom, approx=True)            # (B, 128) lane-dense


def make_params(key):
    ks = jax.random.split(key, 12)
    p = {}
    p["emb_table"] = 0.1 * jax.random.normal(ks[0], (VOCAB, PROJ), jnp.float32)
    # Linear weights stored pre-transposed as (in, out)
    p["wp"] = 0.1 * jax.random.normal(ks[1], (PROJ, PROJ), jnp.float32)
    p["bp"] = 0.1 * jax.random.normal(ks[2], (1, PROJ), jnp.float32)
    p["w2"] = 0.2 * jax.random.normal(ks[3], (NKER, 2), jnp.float32)
    p["b2"] = 0.1 * jax.random.normal(ks[4], (NKER,), jnp.float32)
    p["w3"] = 0.2 * jax.random.normal(ks[5], (NKER, 3), jnp.float32)
    p["b3"] = 0.1 * jax.random.normal(ks[6], (NKER,), jnp.float32)
    p["w4"] = 0.2 * jax.random.normal(ks[7], (NKER, 4), jnp.float32)
    p["b4"] = 0.1 * jax.random.normal(ks[8], (NKER,), jnp.float32)
    p["wf"] = 0.05 * jax.random.normal(ks[9], (FEAT, HIDDEN), jnp.float32)
    p["bf"] = 0.05 * jax.random.normal(ks[10], (1, HIDDEN), jnp.float32)
    p["wh"] = 0.05 * jax.random.normal(ks[11], (HIDDEN, NUM_CLS), jnp.float32)
    p["bh"] = jnp.zeros((1, NUM_CLS), jnp.float32)
    return p


def prepare_params(p):
    """One-time layout plumbing: fold, pad and pack params into 5 kernel-ready
    slabs.  All padding is zeros (or -1e30 for padded head-bias lanes), so the
    softmax over the real 3 classes is unchanged."""
    kp = {}

    # --- folded embedding gather+projection table: (128, 128) bf16 ---
    table_pad = jnp.pad(p["emb_table"], ((0, VOCAB_PAD - VOCAB), (0, 0)))   # (128, 32)
    wp_tiled = jnp.tile(p["wp"], (1, NKER))                                 # (32, 128)
    kp["table_proj"] = (table_pad @ wp_tiled).astype(jnp.bfloat16)          # (128, 128)

    # --- conv-weight slab: rows [0:2]=w2, [2:5]=w3, [5:9]=w4, lane j*PROJ+e -> ch j ---
    def lane_rep_w(w):                                    # (NKER, kh) -> (kh, 128)
        return jnp.repeat(w.T, PROJ, axis=1).astype(jnp.float32)
    conv_w = jnp.concatenate([lane_rep_w(p["w2"]),
                              lane_rep_w(p["w3"]),
                              lane_rep_w(p["w4"])], axis=0)                 # (9, 128)
    kp["conv_w"] = jnp.pad(conv_w, ((0, CONVW_PAD - CONV_ROWS), (0, 0)))    # (16, 128)

    # --- bias slab (8, 512): rows = bp | b2 | b3 | b4 | bf | bh | 0 | 0 ---
    def lane_rep_b(b):                                    # (NKER,) -> (512,)
        return jnp.pad(jnp.repeat(b, PROJ), (0, HIDDEN_PAD - LANES))
    bp_row = jnp.pad(jnp.tile(p["bp"], (1, NKER))[0], (0, HIDDEN_PAD - LANES))
    bf_row = jnp.pad(p["bf"][0], (0, HIDDEN_PAD - HIDDEN))
    bh_row = jnp.pad(p["bh"][0], (0, HIDDEN_PAD - NUM_CLS), constant_values=NEG)
    bias = jnp.stack([bp_row, lane_rep_b(p["b2"]), lane_rep_b(p["b3"]),
                      lane_rep_b(p["b4"]), bf_row, bh_row], axis=0)         # (6, 512)
    kp["bias"] = jnp.pad(bias, ((0, 8 - bias.shape[0]), (0, 0)))            # (8, 512)

    # --- final projection padded 505 -> 512 (zero cols); head padded to (512, 128) ---
    kp["wf"] = jnp.pad(p["wf"], ((0, 0), (0, HIDDEN_PAD - HIDDEN))).astype(jnp.bfloat16)
    kp["wh"] = jnp.pad(p["wh"], ((0, HIDDEN_PAD - HIDDEN),
                                 (0, LANES - NUM_CLS))).astype(jnp.bfloat16)
    return kp


@jax.jit
def my_model_conv(tokens, kp):
    tok_col = tokens.reshape(BATCH * SEQ, 1).astype(jnp.int32)
    vmem = pl.BlockSpec(memory_space=pltpu.MemorySpace.VMEM)
    probs = pl.pallas_call(
        fused_kernel,
        out_shape=jax.ShapeDtypeStruct((BATCH, LANES), jnp.float32),
        in_specs=[vmem] * 6,
        out_specs=vmem,
    )(tok_col, kp["table_proj"], kp["conv_w"], kp["bias"], kp["wf"], kp["wh"])
    return probs[:, :NUM_CLS]


def reference_forward(tokens, p):
    """Pure-JAX f32 reference of the PyTorch forward (eval mode)."""
    emb = p["emb_table"][tokens]                                    # (B, S, 32)
    proj = jnp.maximum(emb @ p["wp"] + p["bp"], 0.0)
    pooled = []
    for kh, w, b in ((2, p["w2"], p["b2"]),
                     (3, p["w3"], p["b3"]),
                     (4, p["w4"], p["b4"])):
        h_out = SEQ - kh + 1
        for o in range(NKER):
            acc = jnp.zeros((tokens.shape[0], h_out, PROJ), jnp.float32)
            for dh in range(kh):
                acc = acc + w[o, dh] * proj[:, dh:dh + h_out, :]
            acc = jnp.maximum(acc + b[o], 0.0)
            pooled.append(jnp.max(acc, axis=1))                     # (B, 32)
    feats = jnp.concatenate(pooled, axis=-1)                        # (B, 384) [conv, ch, emb]
    hidden = jnp.maximum(feats @ p["wf"] + p["bf"], 0.0)
    logits = hidden @ p["wh"] + p["bh"]
    return jax.nn.softmax(logits, axis=-1)


if __name__ == "__main__":
    key = jax.random.PRNGKey(0)
    k_tok, k_par = jax.random.split(key)
    tokens = jax.random.randint(k_tok, (BATCH, SEQ), 0, VOCAB, dtype=jnp.int32)
    params = make_params(k_par)
    kparams = prepare_params(params)          # one-time fold/pad/pack layout prep

    out = my_model_conv(tokens, kparams)
    out = jax.block_until_ready(out)

    assert out.shape == (BATCH, NUM_CLS)
    assert bool(jnp.all(jnp.isfinite(out)))
    # softmax rows must sum to ~1 (approx-reciprocal denominator)
    assert bool(jnp.all(jnp.abs(jnp.sum(out, axis=-1) - 1.0) < 5e-3))
    # must match the pure-JAX f32 reference (kernel uses bf16 MXU operands)
    ref = reference_forward(tokens, params)
    assert bool(jnp.all(jnp.abs(out - ref) < 2e-2))
    # TODO(synk): nn.Dropout(0.5) is treated as identity (inference semantics).
    print("KERNEL_OK")
</pallas_src>

<mosaic_0001>
module attributes {stable_mosaic.version = 11 : i64} {
  func.func @fused_kernel(%arg0: memref<16x1xi32, #tpu.memory_space<vmem>>, %arg1: memref<128x128xbf16, #tpu.memory_space<vmem>>, %arg2: memref<16x128xf32, #tpu.memory_space<vmem>>, %arg3: memref<8x512xf32, #tpu.memory_space<vmem>>, %arg4: memref<384x512xbf16, #tpu.memory_space<vmem>>, %arg5: memref<512x128xbf16, #tpu.memory_space<vmem>>, %arg6: memref<2x128xf32, #tpu.memory_space<vmem>>) attributes {dimension_semantics = [], scalar_prefetch = 0 : i64, scratch_operands = 0 : i64, tpu.core_type = #tpu.core_type<tc>} {
    %c0 = arith.constant 0 : index
    %c0_0 = arith.constant 0 : index
    %0 = vector.load %arg0[%c0, %c0_0] : memref<16x1xi32, #tpu.memory_space<vmem>>, vector<16x1xi32>
    %1 = tpu.iota {dimensions = array<i32: 1>} : vector<16x128xi32>
    %2 = vector.broadcast %0 : vector<16x1xi32> to vector<16x128xi32>
    %3 = arith.cmpi eq, %1, %2 : vector<16x128xi32>
    %4 = arith.extui %3 : vector<16x128xi1> to vector<16x128xi32>
    %5 = arith.sitofp %4 : vector<16x128xi32> to vector<16x128xf32>
    %6 = arith.truncf %5 : vector<16x128xf32> to vector<16x128xbf16>
    %c0_1 = arith.constant 0 : index
    %c0_2 = arith.constant 0 : index
    %7 = vector.load %arg3[%c0_1, %c0_2] : memref<8x512xf32, #tpu.memory_space<vmem>>, vector<1x128xf32>
    %c0_3 = arith.constant 0 : index
    %c0_4 = arith.constant 0 : index
    %8 = vector.load %arg1[%c0_3, %c0_4] : memref<128x128xbf16, #tpu.memory_space<vmem>>, vector<128x128xbf16>
    %cst = arith.constant dense<0.000000e+00> : vector<16x128xf32>
    %9 = tpu.matmul %6, %8, %cst {dimension_numbers = #tpu.dot_dimension_numbers<[1], [0], [0], [1], [0, 0, 1, 1], [], []>} : vector<16x128xbf16>, vector<128x128xbf16>, vector<16x128xf32> -> vector<16x128xf32>
    %10 = vector.broadcast %7 : vector<1x128xf32> to vector<16x128xf32>
    %11 = arith.addf %9, %10 : vector<16x128xf32>
    %cst_5 = arith.constant 0.000000e+00 : f32
    %12 = vector.broadcast %cst_5 : f32 to vector<16x128xf32>
    %13 = arith.maximumf %11, %12 : vector<16x128xf32>
    %14 = vector.shape_cast %13 : vector<16x128xf32> to vector<2x8x128xf32>
    %15 = vector.extract_strided_slice %14 {offsets = [0, 0, 0], sizes = [2, 7, 128], strides = [1, 1, 1]} : vector<2x8x128xf32> to vector<2x7x128xf32>
    %c0_6 = arith.constant 0 : index
    %c0_7 = arith.constant 0 : index
    %16 = vector.load %arg2[%c0_6, %c0_7] : memref<16x128xf32, #tpu.memory_space<vmem>>, vector<1x128xf32>
    %17 = vector.shape_cast %16 : vector<1x128xf32> to vector<1x1x128xf32>
    %18 = vector.broadcast %17 : vector<1x1x128xf32> to vector<2x7x128xf32>
    %19 = arith.mulf %15, %18 : vector<2x7x128xf32>
    %20 = vector.extract_strided_slice %14 {offsets = [0, 1, 0], sizes = [2, 7, 128], strides = [1, 1, 1]} : vector<2x8x128xf32> to vector<2x7x128xf32>
    %c1 = arith.constant 1 : index
    %c0_8 = arith.constant 0 : index
    %21 = vector.load %arg2[%c1, %c0_8] : memref<16x128xf32, #tpu.memory_space<vmem>>, vector<1x128xf32>
    %22 = vector.shape_cast %21 : vector<1x128xf32> to vector<1x1x128xf32>
    %23 = vector.broadcast %22 : vector<1x1x128xf32> to vector<2x7x128xf32>
    %24 = arith.mulf %20, %23 : vector<2x7x128xf32>
    %25 = arith.addf %19, %24 : vector<2x7x128xf32>
    %c1_9 = arith.constant 1 : index
    %c0_10 = arith.constant 0 : index
    %26 = vector.load %arg3[%c1_9, %c0_10] : memref<8x512xf32, #tpu.memory_space<vmem>>, vector<1x128xf32>
    %27 = vector.shape_cast %26 : vector<1x128xf32> to vector<1x1x128xf32>
    %28 = vector.broadcast %27 : vector<1x1x128xf32> to vector<2x7x128xf32>
    %29 = arith.addf %25, %28 : vector<2x7x128xf32>
    %cst_11 = arith.constant 0.000000e+00 : f32
    %30 = vector.broadcast %cst_11 : f32 to vector<2x7x128xf32>
    %31 = arith.maximumf %29, %30 : vector<2x7x128xf32>
    %cst_12 = arith.constant dense<0xFF800000> : vector<2x128xf32>
    %32 = vector.multi_reduction <maximumf>, %31, %cst_12 [1] : vector<2x7x128xf32> to vector<2x128xf32>
    %33 = vector.extract_strided_slice %14 {offsets = [0, 0, 0], sizes = [2, 6, 128], strides = [1, 1, 1]} : vector<2x8x128xf32> to vector<2x6x128xf32>
    %c2 = arith.constant 2 : index
    %c0_13 = arith.constant 0 : index
    %34 = vector.load %arg2[%c2, %c0_13] : memref<16x128xf32, #tpu.memory_space<vmem>>, vector<1x128xf32>
    %35 = vector.shape_cast %34 : vector<1x128xf32> to vector<1x1x128xf32>
    %36 = vector.broadcast %35 : vector<1x1x128xf32> to vector<2x6x128xf32>
    %37 = arith.mulf %33, %36 : vector<2x6x128xf32>
    %38 = vector.extract_strided_slice %14 {offsets = [0, 1, 0], sizes = [2, 6, 128], strides = [1, 1, 1]} : vector<2x8x128xf32> to vector<2x6x128xf32>
    %c3 = arith.constant 3 : index
    %c0_14 = arith.constant 0 : index
    %39 = vector.load %arg2[%c3, %c0_14] : memref<16x128xf32, #tpu.memory_space<vmem>>, vector<1x128xf32>
    %40 = vector.shape_cast %39 : vector<1x128xf32> to vector<1x1x128xf32>
    %41 = vector.broadcast %40 : vector<1x1x128xf32> to vector<2x6x128xf32>
    %42 = arith.mulf %38, %41 : vector<2x6x128xf32>
    %43 = arith.addf %37, %42 : vector<2x6x128xf32>
    %44 = vector.extract_strided_slice %14 {offsets = [0, 2, 0], sizes = [2, 6, 128], strides = [1, 1, 1]} : vector<2x8x128xf32> to vector<2x6x128xf32>
    %c4 = arith.constant 4 : index
    %c0_15 = arith.constant 0 : index
    %45 = vector.load %arg2[%c4, %c0_15] : memref<16x128xf32, #tpu.memory_space<vmem>>, vector<1x128xf32>
    %46 = vector.shape_cast %45 : vector<1x128xf32> to vector<1x1x128xf32>
    %47 = vector.broadcast %46 : vector<1x1x128xf32> to vector<2x6x128xf32>
    %48 = arith.mulf %44, %47 : vector<2x6x128xf32>
    %49 = arith.addf %43, %48 : vector<2x6x128xf32>
    %c2_16 = arith.constant 2 : index
    %c0_17 = arith.constant 0 : index
    %50 = vector.load %arg3[%c2_16, %c0_17] : memref<8x512xf32, #tpu.memory_space<vmem>>, vector<1x128xf32>
    %51 = vector.shape_cast %50 : vector<1x128xf32> to vector<1x1x128xf32>
    %52 = vector.broadcast %51 : vector<1x1x128xf32> to vector<2x6x128xf32>
    %53 = arith.addf %49, %52 : vector<2x6x128xf32>
    %cst_18 = arith.constant 0.000000e+00 : f32
    %54 = vector.broadcast %cst_18 : f32 to vector<2x6x128xf32>
    %55 = arith.maximumf %53, %54 : vector<2x6x128xf32>
    %cst_19 = arith.constant dense<0xFF800000> : vector<2x128xf32>
    %56 = vector.multi_reduction <maximumf>, %55, %cst_19 [1] : vector<2x6x128xf32> to vector<2x128xf32>
    %57 = vector.extract_strided_slice %14 {offsets = [0, 0, 0], sizes = [2, 5, 128], strides = [1, 1, 1]} : vector<2x8x128xf32> to vector<2x5x128xf32>
    %c5 = arith.constant 5 : index
    %c0_20 = arith.constant 0 : index
    %58 = vector.load %arg2[%c5, %c0_20] : memref<16x128xf32, #tpu.memory_space<vmem>>, vector<1x128xf32>
    %59 = vector.shape_cast %58 : vector<1x128xf32> to vector<1x1x128xf32>
    %60 = vector.broadcast %59 : vector<1x1x128xf32> to vector<2x5x128xf32>
    %61 = arith.mulf %57, %60 : vector<2x5x128xf32>
    %62 = vector.extract_strided_slice %14 {offsets = [0, 1, 0], sizes = [2, 5, 128], strides = [1, 1, 1]} : vector<2x8x128xf32> to vector<2x5x128xf32>
    %c6 = arith.constant 6 : index
    %c0_21 = arith.constant 0 : index
    %63 = vector.load %arg2[%c6, %c0_21] : memref<16x128xf32, #tpu.memory_space<vmem>>, vector<1x128xf32>
    %64 = vector.shape_cast %63 : vector<1x128xf32> to vector<1x1x128xf32>
    %65 = vector.broadcast %64 : vector<1x1x128xf32> to vector<2x5x128xf32>
    %66 = arith.mulf %62, %65 : vector<2x5x128xf32>
    %67 = arith.addf %61, %66 : vector<2x5x128xf32>
    %68 = vector.extract_strided_slice %14 {offsets = [0, 2, 0], sizes = [2, 5, 128], strides = [1, 1, 1]} : vector<2x8x128xf32> to vector<2x5x128xf32>
    %c7 = arith.constant 7 : index
    %c0_22 = arith.constant 0 : index
    %69 = vector.load %arg2[%c7, %c0_22] : memref<16x128xf32, #tpu.memory_space<vmem>>, vector<1x128xf32>
    %70 = vector.shape_cast %69 : vector<1x128xf32> to vector<1x1x128xf32>
    %71 = vector.broadcast %70 : vector<1x1x128xf32> to vector<2x5x128xf32>
    %72 = arith.mulf %68, %71 : vector<2x5x128xf32>
    %73 = arith.addf %67, %72 : vector<2x5x128xf32>
    %74 = vector.extract_strided_slice %14 {offsets = [0, 3, 0], sizes = [2, 5, 128], strides = [1, 1, 1]} : vector<2x8x128xf32> to vector<2x5x128xf32>
    %c8 = arith.constant 8 : index
    %c0_23 = arith.constant 0 : index
    %75 = vector.load %arg2[%c8, %c0_23] : memref<16x128xf32, #tpu.memory_space<vmem>>, vector<1x128xf32>
    %76 = vector.shape_cast %75 : vector<1x128xf32> to vector<1x1x128xf32>
    %77 = vector.broadcast %76 : vector<1x1x128xf32> to vector<2x5x128xf32>
    %78 = arith.mulf %74, %77 : vector<2x5x128xf32>
    %79 = arith.addf %73, %78 : vector<2x5x128xf32>
    %c3_24 = arith.constant 3 : index
    %c0_25 = arith.constant 0 : index
    %80 = vector.load %arg3[%c3_24, %c0_25] : memref<8x512xf32, #tpu.memory_space<vmem>>, vector<1x128xf32>
    %81 = vector.shape_cast %80 : vector<1x128xf32> to vector<1x1x128xf32>
    %82 = vector.broadcast %81 : vector<1x1x128xf32> to vector<2x5x128xf32>
    %83 = arith.addf %79, %82 : vector<2x5x128xf32>
    %cst_26 = arith.constant 0.000000e+00 : f32
    %84 = vector.broadcast %cst_26 : f32 to vector<2x5x128xf32>
    %85 = arith.maximumf %83, %84 : vector<2x5x128xf32>
    %cst_27 = arith.constant dense<0xFF800000> : vector<2x128xf32>
    %86 = vector.multi_reduction <maximumf>, %85, %cst_27 [1] : vector<2x5x128xf32> to vector<2x128xf32>
    %87 = tpu.concatenate %32, %56, %86 in 1 : vector<2x128xf32>, vector<2x128xf32>, vector<2x128xf32> -> vector<2x384xf32>
    %88 = arith.truncf %87 : vector<2x384xf32> to vector<2x384xbf16>
    %c4_28 = arith.constant 4 : index
    %c0_29 = arith.constant 0 : index
    %89 = vector.load %arg3[%c4_28, %c0_29] : memref<8x512xf32, #tpu.memory_space<vmem>>, vector<1x512xf32>
    %c0_30 = arith.constant 0 : index
    %c0_31 = arith.constant 0 : index
    %90 = vector.load %arg4[%c0_30, %c0_31] : memref<384x512xbf16, #tpu.memory_space<vmem>>, vector<384x512xbf16>
    %cst_32 = arith.constant dense<0.000000e+00> : vector<2x512xf32>
    %91 = tpu.matmul %88, %90, %cst_32 {dimension_numbers = #tpu.dot_dimension_numbers<[1], [0], [0], [1], [0, 0, 1, 1], [], []>} : vector<2x384xbf16>, vector<384x512xbf16>, vector<2x512xf32> -> vector<2x512xf32>
    %92 = vector.broadcast %89 : vector<1x512xf32> to vector<2x512xf32>
    %93 = arith.addf %91, %92 : vector<2x512xf32>
    %cst_33 = arith.constant 0.000000e+00 : f32
    %94 = vector.broadcast %cst_33 : f32 to vector<2x512xf32>
    %95 = arith.maximumf %93, %94 : vector<2x512xf32>
    %c5_34 = arith.constant 5 : index
    %c0_35 = arith.constant 0 : index
    %96 = vector.load %arg3[%c5_34, %c0_35] : memref<8x512xf32, #tpu.memory_space<vmem>>, vector<1x128xf32>
    %97 = arith.truncf %95 : vector<2x512xf32> to vector<2x512xbf16>
    %c0_36 = arith.constant 0 : index
    %c0_37 = arith.constant 0 : index
    %98 = vector.load %arg5[%c0_36, %c0_37] : memref<512x128xbf16, #tpu.memory_space<vmem>>, vector<512x128xbf16>
    %cst_38 = arith.constant dense<0.000000e+00> : vector<2x128xf32>
    %99 = tpu.matmul %97, %98, %cst_38 {dimension_numbers = #tpu.dot_dimension_numbers<[1], [0], [0], [1], [0, 0, 1, 1], [], []>} : vector<2x512xbf16>, vector<512x128xbf16>, vector<2x128xf32> -> vector<2x128xf32>
    %100 = vector.broadcast %96 : vector<1x128xf32> to vector<2x128xf32>
    %101 = arith.addf %99, %100 : vector<2x128xf32>
    %cst_39 = arith.constant dense<0xFF800000> : vector<2xf32>
    %102 = vector.multi_reduction <maximumf>, %101, %cst_39 [1] : vector<2x128xf32> to vector<2xf32>
    %103 = vector.shape_cast %102 : vector<2xf32> to vector<2x1xf32>
    %104 = vector.broadcast %103 : vector<2x1xf32> to vector<2x128xf32>
    %105 = arith.subf %101, %104 : vector<2x128xf32>
    %106 = math.exp %105 : vector<2x128xf32>
    %cst_40 = arith.constant dense<0.000000e+00> : vector<2xf32>
    %107 = vector.multi_reduction <add>, %106, %cst_40 [1] : vector<2x128xf32> to vector<2xf32>
    %108 = vector.shape_cast %107 : vector<2xf32> to vector<2x1xf32>
    %109 = tpu.reciprocal %108 {approx = true} : vector<2x1xf32> -> vector<2x1xf32>
    %110 = vector.broadcast %109 : vector<2x1xf32> to vector<2x128xf32>
    %111 = arith.mulf %106, %110 : vector<2x128xf32>
    %c0_41 = arith.constant 0 : index
    %c0_42 = arith.constant 0 : index
    %112 = vector.load %arg6[%c0_41, %c0_42] : memref<2x128xf32, #tpu.memory_space<vmem>>, vector<2x128xf32>
    tpu.vector_store %arg6[%c0_41, %c0_42], %111 {strides = array<i32>} : memref<2x128xf32, #tpu.memory_space<vmem>>, vector<2x128xf32>,
    return
  }
}

</mosaic_0001>

<bundles_post_ra>
// kernel: my_model_conv.1
= control target key start
LH: loop header
LB: loop body
LE: loop exit
PB: predicated region body
PF: predicated region fallthrough
CT: control target
= control target key end

     0   :  { %11 = vsyncpa [#allocation3], 0  ;;  %s2173_s0 = inlined_call_operand.vmem [shape: s32[16,1], index: 0, kind: input, shape index: {}]   ;;  %s2174_s1 = inlined_call_operand.hbm [shape: bf16[128,128], index: 1, kind: input, shape index: {}]   ;;  %s2175_s2 = inlined_call_operand.vmem [shape: f32[16,128], index: 2, kind: input, shape index: {}]   ;;  %s2176_s3 = inlined_call_operand.hbm [shape: f32[8,512], index: 3, kind: input, shape index: {}]   ;;  %s2177_s4 = inlined_call_operand.hbm [shape: bf16[384,512], index: 4, kind: input, shape index: {}]   ;;  %s2178_s5 = inlined_call_operand.hbm [shape: bf16[512,128], index: 5, kind: input, shape index: {}]   ;;  %s2179_s6 = inlined_call_operand.hbm [shape: f32[2,128], index: 6, kind: output, shape index: {}]  }
   0x1   :  { %12 = vsyncpa [#allocation6], 0 }
   0x2   :  { %13 = vsyncpa [#allocation9], 0 }
   0x3   :  { %14 = vsyncpa [#allocation4], 0  ;;  %s2060_s21 = smov [#allocation5]   ;;  %s2061_s23 = smov [#allocation2]  }
   0x4   :  { %s37_s22 = sshll.u32 %s2060_s21, 4  ;;  %s22_s24 = sshll.u32 %s2061_s23, 4  ;;  %s38_s22 = int_to_ptr.vmem [resolvable:$true] %s37_s22  ;;  %s23_s24 = int_to_ptr.vmem [resolvable:$true] %s22_s24 }
   0x5   :  { %s1960_s25 = scalar_lea.vmem %s38_s22, 512  ;;  %p1965_p1 = scmp.lt.s32.totalorder %s38_s22, %s38_s22 }
   0x6   :  { %p1961_p0 = scmp.ne.s32.totalorder %s38_s22, %s1960_s25  ;;  %p1966_p2 = scmp.lt.s32.totalorder %s1960_s25, %s1960_s25 }
   0x8   :  { %p1967_p3 = por %p1966_p2, %p1965_p1 }
   0xa   :  { %p1968_p4 = pnand %p1967_p3, %p1961_p0 }
   0xc   :  { %1971 = shalt.err (!%p1968_p4)
}
   0xd   :  { %40 = dma.hbm_to_vmem [thread:$0]  %s2176_s3, 512, %s38_s22, [#allocation6]  }
   0xe   :  { %s1980_s28 = scalar_lea.vmem %s23_s24, 1024  ;;  %p1985_p6 = scmp.lt.s32.totalorder %s23_s24, %s23_s24 }
   0xf   :  { %p1981_p5 = scmp.ne.s32.totalorder %s23_s24, %s1980_s28  ;;  %p1986_p7 = scmp.lt.s32.totalorder %s1980_s28, %s1980_s28 }
  0x11   :  { %p1987_p8 = por %p1986_p7, %p1985_p6 }
  0x13   :  { %p1988_p9 = pnand %p1987_p8, %p1981_p5 }
  0x15   :  { %1991 = shalt.err (!%p1988_p9)
}
  0x16   :  { %s2062_s29 = smov 64   ;;  %s2063_s30 = smov 4  }
  0x17   :  { %28 = dma.hbm_to_vmem [thread:$0]  %s2174_s1, 1024, %s23_s24, [#allocation3], %s2062_s29, %s2062_s29, %s2063_s30  }
  0x18   :  { %s2064_s9 = smov [#allocation7]  }
  0x19   :  { %s46_s10 = sshll.u32 %s2064_s9, 4  ;;  %s47_s10 = int_to_ptr.vmem [resolvable:$true] %s46_s10 }
  0x1a   :  { %s2000_s11 = scalar_lea.vmem %s47_s10, 12288  ;;  %p2005_p11 = scmp.lt.s32.totalorder %s47_s10, %s47_s10 }
  0x1b   :  { %p2001_p10 = scmp.ne.s32.totalorder %s47_s10, %s2000_s11  ;;  %p2006_p12 = scmp.lt.s32.totalorder %s2000_s11, %s2000_s11 }
  0x1d   :  { %p2007_p13 = por %p2006_p12, %p2005_p11 }
  0x1f   :  { %p2008_p0 = pnand %p2007_p13, %p2001_p10 }
  0x21   :  { %2011 = shalt.err (!%p2008_p0)
}
  0x22   :  { %s2065_s3 = smov 256   ;;  %s2066_s12 = smov 16  }
  0x23   :  { %52 = dma.hbm_to_vmem [thread:$0]  %s2177_s4, 12288, %s47_s10, [#allocation6], %s2065_s3, %s2065_s3, %s2066_s12  }
  0x24   :  { %s2067_s15 = smov [#allocation8]  }
  0x25   :  { %s58_s16 = sshll.u32 %s2067_s15, 4  ;;  %s59_s16 = int_to_ptr.vmem [resolvable:$true] %s58_s16 }
  0x26   :  { %s2020_s1 = scalar_lea.vmem %s59_s16, 4096  ;;  %p2025_p2 = scmp.lt.s32.totalorder %s59_s16, %s59_s16 }
  0x27   :  { %p2021_p1 = scmp.ne.s32.totalorder %s59_s16, %s2020_s1  ;;  %p2026_p3 = scmp.lt.s32.totalorder %s2020_s1, %s2020_s1 }
  0x29   :  { %p2027_p4 = por %p2026_p3, %p2025_p2 }
  0x2b   :  { %p2028_p5 = pnand %p2027_p4, %p2021_p1 }
  0x2d   :  { %2031 = shalt.err (!%p2028_p5)
}
  0x2e   :  { %64 = dma.hbm_to_vmem [thread:$0]  %s2178_s5, 4096, %s59_s16, [#allocation9], %s2062_s29, %s2062_s29, %s2063_s30  }
  0x2f   :  { %2052 = dma.done.wait [#allocation3], 1024  }
  0x30   :  { %2053 = vsyncadd [#allocation3], 4294966272 }
  0x31   :  { %2054 = dma.done.wait [#allocation6], 12800  }
  0x32   :  { %2055 = vsyncadd [#allocation6], 4294954496 }
  0x33   :  { %2056 = dma.done.wait [#allocation9], 4096  }
  0x34   :  { %2057 = vsyncadd [#allocation9], 4294963200  ;;  %v2068_v0 = vmov 0   ;;  %v2069_v1 = vmov 0.0   ;;  %v78_v2 = vld [vmem:[%s2173_s0] sm:$0xff]  ;;  %v1764_v3 = vld [vmem:[#allocation2 + $0x38] sm:$0xff]   ;;  %v80_v26 = vlaneseq }
  0x35   :  { %1763 = vset.pattern.permute.xlu0 %v2068_v0  ;;  %1730 = vmatprep.subr.bf16.mxu0 %v2069_v1  ;;  %v79_v4 = vld [vmem:[%s2173_s0 + $0x8] sm:$0xff]  ;;  %vm2070_vm0 = vmmov 0   ;;  %v1765_v5 = vld [vmem:[#allocation2 + $0x30] sm:$0xff]   ;;  %v1767_v10 = vld [vmem:[#allocation2 + $0x20] sm:$0xff]   ;;  %v2071_v30 = vmov 1.0|1.0  }
  0x36   :  { %83 = vperm.xlu0 %1763, %v78_v2   ;;  %1746 = vmatprep.mubr.msk.bf16.mxu0 %vm2070_vm0, %v2069_v1  ;;  %v1766_v6 = vld [vmem:[#allocation2 + $0x28] sm:$0xff]   ;;  %v1772_v7 = vld [vmem:[#allocation7 + $0xe4] ss:$16 sps:$4 sm:$0xff]   ;;  %v1774_v8 = vld [vmem:[#allocation7 + $0xe0] ss:$16 sps:$4 sm:$0xff]   ;;  %v81_v28 = vand.u32 127, %v80_v26 }
  0x37   :  { %1731 = vmatpush3.bf16.msra.mxu0 %v1764_v3  ;;  %v1775_v9 = vld [vmem:[#allocation7 + $0xc4] ss:$16 sps:$4 sm:$0xff]   ;;  %989 = vmatprep.subr.bf16.mxu1 %v1772_v7  ;;  %v1777_v11 = vld [vmem:[#allocation7 + $0xc0] ss:$16 sps:$4 sm:$0xff]   ;;  %v1768_v13 = vld [vmem:[#allocation2 + $0x18] sm:$0xff]   ;;  %vm287_vm4 = vcmask 1045504  }
  0x38   :  { %1732 = vmatprep.subr.bf16.mxu0 %v2069_v1  ;;  %990 = vmatpush1.bf16.msra.mxu1 %v1774_v8  ;;  %v1778_v12 = vld [vmem:[#allocation7 + $0xa4] ss:$16 sps:$4 sm:$0xff]   ;;  %v1780_v14 = vld [vmem:[#allocation7 + $0xa0] ss:$16 sps:$4 sm:$0xff]   ;;  %v1770_v19 = vld [vmem:[#allocation2 + $0x8] sm:$0xff]   ;;  %vm359_vm5 = vcmask 1044480  }
  0x39   :  { %991 = vmatprep.subr.bf16.mxu1 %v1775_v9  ;;  %v1769_v15 = vld [vmem:[#allocation2 + $0x10] sm:$0xff]   ;;  %v1771_v22 = vld [vmem:[#allocation2] sm:$0xff]   ;;  %v1846_v2 = vld [vmem:[#allocation7 + $0x2ec] ss:$16 sps:$4 sm:$0xff]   ;;  %vm230_vm6 = vcmask 1046528   ;;  %vm376_vm7 = vcmask 1041409  }
  0x3a   :  { %86 = vperm.xlu0 %1763, %v79_v4   ;;  %v1781_v16 = vld [vmem:[#allocation7 + $0x84] ss:$16 sps:$4 sm:$0xff]   ;;  %v1783_v17 = vld [vmem:[#allocation7 + $0x80] ss:$16 sps:$4 sm:$0xff]   ;;  %v1849_v3 = vld [vmem:[#allocation7 + $0xec] ss:$16 sps:$4 sm:$0xff]  }
  0x3b   :  { %1733 = vmatpush3.bf16.msra.mxu0 %v1765_v5  ;;  %v1784_v18 = vld [vmem:[#allocation7 + $0x64] ss:$16 sps:$4 sm:$0xff]   ;;  %v1786_v20 = vld [vmem:[#allocation7 + $0x60] ss:$16 sps:$4 sm:$0xff]   ;;  %vm1498_vm8 = vcmask 1041408  }
  0x3c   :  { %1734 = vmatprep.subr.bf16.mxu0 %v2069_v1  ;;  %992 = vmatpush1.bf16.msra.mxu1 %v1777_v11  ;;  %v1787_v21 = vld [vmem:[#allocation7 + $0x44] ss:$16 sps:$4 sm:$0xff]   ;;  %v1789_v23 = vld [vmem:[#allocation7 + $0x40] ss:$16 sps:$4 sm:$0xff]  }
  0x3d   :  { %993 = vmatprep.subr.bf16.mxu1 %v1778_v12  ;;  %v1790_v24 = vld [vmem:[#allocation7 + $0x24] ss:$16 sps:$4 sm:$0xff]   ;;  %v1792_v25 = vld [vmem:[#allocation7 + $0x20] ss:$16 sps:$4 sm:$0xff]  }
  0x3e   :  { %v1793_v31 = vld [vmem:[#allocation7 + $0x4] ss:$16 sps:$4 sm:$0xff]   ;;  %v1795_v32 = vld [vmem:[#allocation7] ss:$16 sps:$4 sm:$0xff]  }
  0x3f   :  { %1735 = vmatpush3.bf16.msra.mxu0 %v1766_v6  ;;  %v1796_v33 = vld [vmem:[#allocation7 + $0x1e4] ss:$16 sps:$4 sm:$0xff]   ;;  %v1798_v34 = vld [vmem:[#allocation7 + $0x1e0] ss:$16 sps:$4 sm:$0xff]  }
  0x40   :  { %1736 = vmatprep.subr.bf16.mxu0 %v2069_v1  ;;  %994 = vmatpush1.bf16.msra.mxu1 %v1780_v14  ;;  %v1801_v35 = vld [vmem:[#allocation7 + $0x2e4] ss:$16 sps:$4 sm:$0xff]   ;;  %v1799_v36 = vld [vmem:[#allocation7 + $0x2e0] ss:$16 sps:$4 sm:$0xff]  }
  0x41   :  { %995 = vmatprep.subr.bf16.mxu1 %v1781_v16  ;;  %v1802_v37 = vld [vmem:[#allocation7 + $0x1c4] ss:$16 sps:$4 sm:$0xff]   ;;  %v1804_v38 = vld [vmem:[#allocation7 + $0x1c0] ss:$16 sps:$4 sm:$0xff]  }
  0x42   :  { %v1805_v39 = vld [vmem:[#allocation7 + $0x2c0] ss:$16 sps:$4 sm:$0xff]   ;;  %v1807_v40 = vld [vmem:[#allocation7 + $0x2c4] ss:$16 sps:$4 sm:$0xff]  }
  0x43   :  { %1737 = vmatpush3.bf16.msra.mxu0 %v1767_v10  ;;  %v1808_v41 = vld [vmem:[#allocation7 + $0x1a4] ss:$16 sps:$4 sm:$0xff]   ;;  %v1810_v43 = vld [vmem:[#allocation7 + $0x1a0] ss:$16 sps:$4 sm:$0xff]  }
  0x44   :  { %1738 = vmatprep.subr.bf16.mxu0 %v2069_v1  ;;  %996 = vmatpush1.bf16.msra.mxu1 %v1783_v17  ;;  %v1813_v42 = vld [vmem:[#allocation7 + $0x2a4] ss:$16 sps:$4 sm:$0xff]   ;;  %v1811_v44 = vld [vmem:[#allocation7 + $0x2a0] ss:$16 sps:$4 sm:$0xff]  }
  0x45   :  { %997 = vmatprep.subr.bf16.mxu1 %v1784_v18  ;;  %v1814_v45 = vld [vmem:[#allocation7 + $0x184] ss:$16 sps:$4 sm:$0xff]   ;;  %v1816_v47 = vld [vmem:[#allocation7 + $0x180] ss:$16 sps:$4 sm:$0xff]  }
  0x46   :  { %v1819_v46 = vld [vmem:[#allocation7 + $0x284] ss:$16 sps:$4 sm:$0xff]   ;;  %v1817_v48 = vld [vmem:[#allocation7 + $0x280] ss:$16 sps:$4 sm:$0xff]  }
  0x47   :  { %1739 = vmatpush3.bf16.msra.mxu0 %v1768_v13  ;;  %v1820_v49 = vld [vmem:[#allocation7 + $0x164] ss:$16 sps:$4 sm:$0xff]   ;;  %v1822_v51 = vld [vmem:[#allocation7 + $0x160] ss:$16 sps:$4 sm:$0xff]  }
  0x48   :  { %1740 = vmatprep.subr.bf16.mxu0 %v2069_v1  ;;  %998 = vmatpush1.bf16.msra.mxu1 %v1786_v20  ;;  %v1825_v50 = vld [vmem:[#allocation7 + $0x264] ss:$16 sps:$4 sm:$0xff]   ;;  %v1823_v52 = vld [vmem:[#allocation7 + $0x260] ss:$16 sps:$4 sm:$0xff]  }
  0x49   :  { %999 = vmatprep.subr.bf16.mxu1 %v1787_v21  ;;  %v1826_v53 = vld [vmem:[#allocation7 + $0x144] ss:$16 sps:$4 sm:$0xff]   ;;  %v1828_v55 = vld [vmem:[#allocation7 + $0x140] ss:$16 sps:$4 sm:$0xff]  }
  0x4a   :  { %v1831_v54 = vld [vmem:[#allocation7 + $0x244] ss:$16 sps:$4 sm:$0xff]   ;;  %v1829_v56 = vld [vmem:[#allocation7 + $0x240] ss:$16 sps:$4 sm:$0xff]  }
  0x4b   :  { %1741 = vmatpush3.bf16.msra.mxu0 %v1769_v15  ;;  %v1832_v57 = vld [vmem:[#allocation7 + $0x124] ss:$16 sps:$4 sm:$0xff]   ;;  %v1834_v59 = vld [vmem:[#allocation7 + $0x120] ss:$16 sps:$4 sm:$0xff]   ;;  %v1548_v15 = vld [vmem:[%s2175_s2 + $0x8] ss:$0 sm:$0xff] }
  0x4c   :  { %1742 = vmatprep.subr.bf16.mxu0 %v2069_v1  ;;  %1000 = vmatpush1.bf16.msra.mxu1 %v1789_v23  ;;  %v1837_v58 = vld [vmem:[#allocation7 + $0x224] ss:$16 sps:$4 sm:$0xff]   ;;  %v1835_v60 = vld [vmem:[#allocation7 + $0x220] ss:$16 sps:$4 sm:$0xff]  }
  0x4d   :  { %1001 = vmatprep.subr.bf16.mxu1 %v1790_v24  ;;  %v1838_v61 = vld [vmem:[#allocation7 + $0x104] ss:$16 sps:$4 sm:$0xff]   ;;  %v1840_v63 = vld [vmem:[#allocation7 + $0x100] ss:$16 sps:$4 sm:$0xff]  }
  0x4e   :  { %v1843_v62 = vld [vmem:[#allocation7 + $0x204] ss:$16 sps:$4 sm:$0xff]   ;;  %v95_v4 = vld [vmem:[#allocation5] ss:$0 sm:$0xff]  ;;  %v1543_v8 = vld [vmem:[%s2175_s2 + $0x3] ss:$0 sm:$0xff] }
  0x4f   :  { %1743 = vmatpush3.bf16.msra.mxu0 %v1770_v19  ;;  %v1544_v9 = vld [vmem:[%s2175_s2 + $0x4] ss:$0 sm:$0xff]  ;;  %v1546_v11 = vld [vmem:[%s2175_s2 + $0x6] ss:$0 sm:$0xff]  ;;  %v1547_v12 = vld [vmem:[%s2175_s2 + $0x7] ss:$0 sm:$0xff] }
  0x50   :  { %1744 = vmatprep.subr.bf16.mxu0 %v2069_v1  ;;  %1002 = vmatpush1.bf16.msra.mxu1 %v1792_v25  ;;  %v1841_v1 = vld [vmem:[#allocation7 + $0x200] ss:$16 sps:$4 sm:$0xff]   ;;  %v1545_v19 = vld [vmem:[%s2175_s2 + $0x5] ss:$0 sm:$0xff] }
  0x51   :  { %1003 = vmatprep.subr.bf16.mxu1 %v1793_v31  ;;  %v1542_v14 = vld [vmem:[%s2175_s2 + $0x2] ss:$0 sm:$0xff]  ;;  %v1540_v20 = vld [vmem:[%s2175_s2] ss:$0 sm:$0xff] }
  0x53   :  { %1745 = vmatpush3.bf16.msra.mxu0 %v1771_v22 }
  0x54   :  { %1004 = vmatpush1.bf16.msra.mxu1 %v1795_v32  ;;  %1030 = vmatprep.subr.bf16.mxu0 %v1801_v35 }
  0x55   :  { %1005 = vmatprep.subr.bf16.mxu1 %v1796_v33 }
  0x58   :  { %1006 = vmatpush2.bf16.msra.mxu1 %v1798_v34 }
  0x59   :  { %1007 = vmatprep.subr.bf16.mxu1 %v1802_v37 }
  0x5c   :  { %1008 = vmatpush2.bf16.msra.mxu1 %v1804_v38  ;;  %v282_v38 = vld [vmem:[#allocation5 + $0x2] ss:$0 sm:$0xff] }
  0x5d   :  { %1009 = vmatprep.subr.bf16.mxu1 %v1808_v41 }
  0x60   :  { %1010 = vmatpush2.bf16.msra.mxu1 %v1810_v43 }
  0x61   :  { %1011 = vmatprep.subr.bf16.mxu1 %v1814_v45 }
  0x64   :  { %1012 = vmatpush2.bf16.msra.mxu1 %v1816_v47 }
  0x65   :  { %1013 = vmatprep.subr.bf16.mxu1 %v1820_v49 }
  0x68   :  { %1014 = vmatpush2.bf16.msra.mxu1 %v1822_v51 }
  0x69   :  { %1015 = vmatprep.subr.bf16.mxu1 %v1826_v53 }
  0x6c   :  { %1016 = vmatpush2.bf16.msra.mxu1 %v1828_v55 }
  0x6d   :  { %1017 = vmatprep.subr.bf16.mxu1 %v1832_v57 }
  0x70   :  { %1018 = vmatpush2.bf16.msra.mxu1 %v1834_v59 }
  0x71   :  { %1019 = vmatprep.subr.bf16.mxu1 %v1838_v61 }
  0x74   :  { %1020 = vmatpush2.bf16.msra.mxu1 %v1840_v63 }
  0x75   :  { %1112 = vmatprep.subr.bf16.mxu1 %v1846_v2 }
  0xb1   :  { %v84_v27 = vpop.permute.xlu0 %83 }
  0xb2   :  { %vm88_vm1 = vcmp.eq.s32.totalorder %v81_v28, %v84_v27 }
  0xb5   :  { %v87_v29 = vpop.permute.xlu0 %86 }
  0xb6   :  { %vm89_vm2 = vcmp.eq.s32.totalorder %v81_v28, %v87_v29  ;;  %v1541_v29 = vld [vmem:[%s2175_s2 + $0x1] ss:$0 sm:$0xff]  ;;  %s2072_s2 = smov [#allocation10]  }
  0xb7   :  { %vm1538_vm3 = vmpackc.low %vm89_vm2, %vm88_vm1  ;;  %s1517_s13 = sshll.u32 %s2072_s2, 4  ;;  %s1518_s13 = int_to_ptr.vmem [resolvable:$true] %s1517_s13 }
  0xb8   :  { %1747 = vmatmul.mubr.msk.bf16.vlgmr.msra.gmra.mxu0 %vm1538_vm3, %v2071_v30  ;;  %s2032_s14 = scalar_lea.vmem %s1518_s13, 32  ;;  %p2037_p7 = scmp.lt.s32.totalorder %s1518_s13, %s1518_s13 }
  0xb9   :  { %1062 = vmatprep.mubr.bf16.mxu0 %v2068_v0  ;;  %1031 = vmatpush1.bf16.msra.mxu0 %v1799_v36  ;;  %p2033_p6 = scmp.ne.s32.totalorder %s1518_s13, %s2032_s14  ;;  %p2038_p8 = scmp.lt.s32.totalorder %s2032_s14, %s2032_s14 }
  0xba   :  { %1032 = vmatprep.subr.bf16.mxu0 %v1807_v40 }
  0xbb   :  { %p2039_p9 = por %p2038_p8, %p2037_p7 }
  0xbd   :  { %1033 = vmatpush1.bf16.msra.mxu0 %v1805_v39  ;;  %p2040_p10 = pnand %p2039_p9, %p2033_p6 }
  0xbe   :  { %1034 = vmatprep.subr.bf16.mxu0 %v1813_v42 }
  0xc1   :  { %1035 = vmatpush1.bf16.msra.mxu0 %v1811_v44 }
  0xc2   :  { %1036 = vmatprep.subr.bf16.mxu0 %v1819_v46 }
  0xc5   :  { %1037 = vmatpush1.bf16.msra.mxu0 %v1817_v48 }
  0xc6   :  { %1038 = vmatprep.subr.bf16.mxu0 %v1825_v50 }
  0xc9   :  { %1039 = vmatpush1.bf16.msra.mxu0 %v1823_v52 }
  0xca   :  { %1040 = vmatprep.subr.bf16.mxu0 %v1831_v54  ;;  %v354_v54 = vld [vmem:[#allocation5 + $0x3] ss:$0 sm:$0xff] }
  0xcd   :  { %1041 = vmatpush1.bf16.msra.mxu0 %v1829_v56 }
  0xce   :  { %1042 = vmatprep.subr.bf16.mxu0 %v1837_v58 }
  0xd1   :  { %1043 = vmatpush1.bf16.msra.mxu0 %v1835_v60 }
  0xd2   :  { %1044 = vmatprep.subr.bf16.mxu0 %v1843_v62 }
  0xd5   :  { %1045 = vmatpush1.bf16.msra.mxu0 %v1841_v1  ;;  %v225_v1 = vld [vmem:[#allocation5 + $0x1] ss:$0 sm:$0xff] }
  0xd6   :  { %1071 = vmatprep.subr.bf16.mxu0 %v1849_v3 }
 0x178   :  { %v194_v5 = vpop.f32.mrf.mxu0 }
 0x179   :  { %v195_v6 = vadd.f32 %v194_v5, %v95_v4 }
 0x17a   :  { %v1748_v7 = vpop.f32.mrf.mxu0 }
 0x17b   :  { %v201_v10 = vmax.f32 %v195_v6, 0.0 }
 0x17c   :  { %v197_v13 = vpop.f32.mrf.mxu0 }
 0x17d   :  { %v198_v16 = vadd.f32 %v197_v13, %v95_v4  ;;  %v257_v17 = vmul.f32 %v1543_v8, %v201_v10  ;;  %v272_v18 = vmul.f32 %v1544_v9, %v201_v10  ;;  %v314_v22 = vmul.f32 %v1546_v11, %v201_v10 }
 0x17e   :  { %v1749_v21 = vpop.f32.mrf.mxu0  ;;  %v329_v23 = vmul.f32 %v1547_v12, %v201_v10  ;;  %v250_v25 = vmul.f32 %v1542_v14, %v201_v10  ;;  %v344_v28 = vmul.f32 %v1548_v15, %v201_v10  ;;  %v307_v31 = vmul.f32 %v1545_v19, %v201_v10 }
 0x17f   :  { %v202_v24 = vmax.f32 %v198_v16, 0.0  ;;  %v261_v27 = vrot.slane %v257_v17, 1  ;;  %v276_v30 = vrot.slane %v272_v18, 2  ;;  %v318_v32 = vrot.slane %v314_v22, 1 }
 0x180   :  { %v208_v33 = vmul.f32 %v1540_v20, %v201_v10  ;;  %v333_v37 = vrot.slane %v329_v23, 2  ;;  %v215_v42 = vmul.f32 %v1541_v29, %v201_v10  ;;  %v348_v46 = vrot.slane %v344_v28, 3 }
 0x181   :  { %v258_v34 = vmul.f32 %v1543_v8, %v202_v24  ;;  %v265_v35 = vadd.f32 %v261_v27, %v250_v25  ;;  %v273_v36 = vmul.f32 %v1544_v9, %v202_v24  ;;  %v315_v39 = vmul.f32 %v1546_v11, %v202_v24 }
 0x182   :  { %v322_v40 = vadd.f32 %v318_v32, %v307_v31  ;;  %v330_v41 = vmul.f32 %v1547_v12, %v202_v24  ;;  %v251_v43 = vmul.f32 %v1542_v14, %v202_v24  ;;  %v308_v47 = vmul.f32 %v1545_v19, %v202_v24 }
 0x183   :  { %v262_v44 = vrot.slane %v258_v34, 1  ;;  %v280_v45 = vadd.f32 %v276_v30, %v265_v35  ;;  %v319_v48 = vrot.slane %v315_v39, 1  ;;  %v345_v50 = vmul.f32 %v1548_v15, %v202_v24 }
 0x184   :  { %v337_v49 = vadd.f32 %v333_v37, %v322_v40  ;;  %v277_v52 = vrot.slane %v273_v36, 2  ;;  %v216_v55 = vmul.f32 %v1541_v29, %v202_v24  ;;  %v334_v57 = vrot.slane %v330_v41, 2 }
 0x185   :  { %v266_v51 = vadd.f32 %v262_v44, %v251_v43  ;;  %v283_v53 = vadd.f32 %v282_v38, %v280_v45  ;;  %v323_v56 = vadd.f32 %v319_v48, %v308_v47  ;;  %v219_v59 = vrot.slane %v215_v42, 1 }
 0x186   :  { %v352_v58 = vadd.f32 %v348_v46, %v337_v49  ;;  %v209_v62 = vmul.f32 %v1540_v20, %v202_v24  ;;  %v220_v63 = vrot.slane %v216_v55, 1  ;;  %v349_v3 = vrot.slane %v345_v50, 3 }
 0x187   :  { %v281_v60 = vadd.f32 %v277_v52, %v266_v51  ;;  %v285_v61 = vmax.f32 %v283_v53, 0.0  ;;  %v338_v2 = vadd.f32 %v334_v57, %v323_v56  ;;  %v223_v5 = vadd.f32 %v219_v59, %v208_v33 }
 0x188   :  { %v355_v4 = vadd.f32 %v354_v54, %v352_v58  ;;  %v224_v8 = vadd.f32 %v220_v63, %v209_v62  ;;  %v1844_v62 = vld [vmem:[#allocation7 + $0x2e8] ss:$16 sps:$4 sm:$0xff]  }
 0x189   :  { %v284_v6 = vadd.f32 %v282_v38, %v281_v60  ;;  %v288_v7 = vsel %vm287_vm4, %v285_v61, -inf  ;;  %v353_v10 = vadd.f32 %v349_v3, %v338_v2  ;;  %v226_v12 = vadd.f32 %v225_v1, %v223_v5  ;;  %v1847_v3 = vld [vmem:[#allocation7 + $0xe8] ss:$16 sps:$4 sm:$0xff]   ;;  %v1852_v5 = vld [vmem:[#allocation7 + $0x2cc] ss:$16 sps:$4 sm:$0xff]  }
 0x18a   :  { %v289_v9 = vrot.slane %v288_v7, 4  ;;  %v357_v11 = vmax.f32 %v355_v4, 0.0  ;;  %v227_v14 = vadd.f32 %v225_v1, %v224_v8  ;;  %v1853_v8 = vld [vmem:[#allocation7 + $0xc8] ss:$16 sps:$4 sm:$0xff]  }
 0x18b   :  { %v286_v13 = vmax.f32 %v284_v6, 0.0  ;;  %v356_v16 = vadd.f32 %v354_v54, %v353_v10  ;;  %v228_v18 = vmax.f32 %v226_v12, 0.0  ;;  %v1855_v6 = vld [vmem:[#allocation7 + $0xcc] ss:$16 sps:$4 sm:$0xff]   ;;  %v1859_v12 = vld [vmem:[#allocation7 + $0xa8] ss:$16 sps:$4 sm:$0xff]  }
 0x18c   :  { %v290_v15 = vmax.f32 %v288_v7, %v289_v9  ;;  %v360_v17 = vsel %vm359_vm5, %v357_v11, -inf  ;;  %v229_v21 = vmax.f32 %v227_v14, 0.0  ;;  %v1850_v7 = vld [vmem:[#allocation7 + $0x2c8] ss:$16 sps:$4 sm:$0xff]   ;;  %v1858_v9 = vld [vmem:[#allocation7 + $0x2ac] ss:$16 sps:$4 sm:$0xff]  }
 0x18d   :  { %v295_v19 = vsel %vm287_vm4, %v286_v13, -inf  ;;  %v361_v20 = vrot.slane %v360_v17, 4  ;;  %v358_v24 = vmax.f32 %v356_v16, 0.0  ;;  %v231_v25 = vsel %vm230_vm6, %v228_v18, -inf  ;;  %v1861_v10 = vld [vmem:[#allocation7 + $0xac] ss:$16 sps:$4 sm:$0xff]  }
 0x18e   :  { %v291_v22 = vrot.slane %v290_v15, 2  ;;  %v296_v23 = vrot.slane %v295_v19, 4  ;;  %v232_v28 = vrot.slane %v231_v25, 4  ;;  %v238_v29 = vsel %vm230_vm6, %v229_v21, -inf  ;;  %v1856_v11 = vld [vmem:[#allocation7 + $0x2a8] ss:$16 sps:$4 sm:$0xff]  }
 0x18f   :  { %v362_v27 = vmax.f32 %v360_v17, %v361_v20  ;;  %v367_v32 = vsel %vm359_vm5, %v358_v24, -inf  ;;  %v239_v33 = vrot.slane %v238_v29, 4  ;;  %v1864_v13 = vld [vmem:[#allocation7 + $0x28c] ss:$16 sps:$4 sm:$0xff]   ;;  %v1865_v16 = vld [vmem:[#allocation7 + $0x88] ss:$16 sps:$4 sm:$0xff]  }
 0x190   :  { %v292_v30 = vmax.f32 %v290_v15, %v291_v22  ;;  %v297_v31 = vmax.f32 %v295_v19, %v296_v23  ;;  %v368_v35 = vrot.slane %v367_v32, 4  ;;  %v233_v36 = vmax.f32 %v231_v25, %v232_v28  ;;  %v1867_v14 = vld [vmem:[#allocation7 + $0x8c] ss:$16 sps:$4 sm:$0xff]   ;;  %v1862_v15 = vld [vmem:[#allocation7 + $0x288] ss:$16 sps:$4 sm:$0xff]  }
 0x191   :  { %v363_v34 = vrot.slane %v362_v27, 2  ;;  %v240_v38 = vmax.f32 %v238_v29, %v239_v33  ;;  %v1870_v17 = vld [vmem:[#allocation7 + $0x26c] ss:$16 sps:$4 sm:$0xff]   ;;  %v1868_v19 = vld [vmem:[#allocation7 + $0x268] ss:$16 sps:$4 sm:$0xff]  }
 0x192   :  { %v298_v37 = vrot.slane %v297_v31, 2  ;;  %v369_v40 = vmax.f32 %v367_v32, %v368_v35  ;;  %v234_v41 = vrot.slane %v233_v36, 2  ;;  %v293_v42 = vrot.slane %v292_v30, 1  ;;  %v1873_v18 = vld [vmem:[#allocation7 + $0x6c] ss:$16 sps:$4 sm:$0xff]  }
 0x193   :  { %v364_v39 = vmax.f32 %v362_v27, %v363_v34  ;;  %v241_v44 = vrot.slane %v240_v38, 2  ;;  %v1876_v20 = vld [vmem:[#allocation7 + $0x24c] ss:$16 sps:$4 sm:$0xff]   ;;  %v1874_v22 = vld [vmem:[#allocation7 + $0x248] ss:$16 sps:$4 sm:$0xff]  }
 0x194   :  { %v299_v43 = vmax.f32 %v297_v31, %v298_v37  ;;  %v370_v45 = vrot.slane %v369_v40, 2  ;;  %v235_v46 = vmax.f32 %v233_v36, %v234_v41  ;;  %v294_v52 = vmax.f32 %v292_v30, %v293_v42  ;;  %v1879_v21 = vld [vmem:[#allocation7 + $0x4c] ss:$16 sps:$4 sm:$0xff]   ;;  %v1877_v23 = vld [vmem:[#allocation7 + $0x48] ss:$16 sps:$4 sm:$0xff]   ;;  %v1918_v37 = vld [vmem:[#allocation8 + $0x70] sm:$0xff]  }
 0x195   :  { %v242_v48 = vmax.f32 %v240_v38, %v241_v44  ;;  %v365_v49 = vrot.slane %v364_v39, 1  ;;  %v1882_v24 = vld [vmem:[#allocation7 + $0x22c] ss:$16 sps:$4 sm:$0xff]   ;;  %v1880_v27 = vld [vmem:[#allocation7 + $0x228] ss:$16 sps:$4 sm:$0xff]  }
 0x196   :  { %v300_v47 = vrot.slane %v299_v43, 1  ;;  %v371_v50 = vmax.f32 %v369_v40, %v370_v45  ;;  %v236_v51 = vrot.slane %v235_v46, 1  ;;  %v1885_v25 = vld [vmem:[#allocation7 + $0x2c] ss:$16 sps:$4 sm:$0xff]   ;;  %v1883_v28 = vld [vmem:[#allocation7 + $0x28] ss:$16 sps:$4 sm:$0xff]  }
 0x197   :  { %v243_v54 = vrot.slane %v242_v48, 1  ;;  %v366_v59 = vmax.f32 %v364_v39, %v365_v49  ;;  %v1888_v29 = vld [vmem:[#allocation7 + $0x20c] ss:$16 sps:$4 sm:$0xff]   ;;  %v1886_v31 = vld [vmem:[#allocation7 + $0x208] ss:$16 sps:$4 sm:$0xff]   ;;  %v1919_v39 = vld [vmem:[#allocation8 + $0x30] sm:$0xff]  }
 0x198   :  { %v301_v53 = vmax.f32 %v299_v43, %v300_v47  ;;  %v372_v55 = vrot.slane %v371_v50, 1  ;;  %v237_v57 = vmax.f32 %v235_v46, %v236_v51  ;;  %v1891_v30 = vld [vmem:[#allocation7 + $0xc] ss:$16 sps:$4 sm:$0xff]   ;;  %v1889_v32 = vld [vmem:[#allocation7 + $0x8] ss:$16 sps:$4 sm:$0xff]   ;;  %v1922_v45 = vld [vmem:[#allocation8 + $0x60] sm:$0xff]  }
 0x199   :  { %v244_v58 = vmax.f32 %v242_v48, %v243_v54  ;;  %v1916_v33 = vld [vmem:[#allocation8 + $0x78] sm:$0xff]   ;;  %v1920_v41 = vld [vmem:[#allocation8 + $0x68] sm:$0xff]   ;;  %v1923_v47 = vld [vmem:[#allocation8 + $0x20] sm:$0xff]  }
 0x19a   :  { %v381_v56 = vsel %vm376_vm7, %v301_v53, %v294_v52  ;;  %v373_v60 = vmax.f32 %v371_v50, %v372_v55  ;;  %v1894_v34 = vld [vmem:[#allocation7 + $0x1ec] ss:$16 sps:$4 sm:$0xff]   ;;  %v1892_v36 = vld [vmem:[#allocation7 + $0x1e8] ss:$16 sps:$4 sm:$0xff]  }
 0x19b   :  { %v388_v61 = vpack.c.bf16 %v381_v56, %v381_v56  ;;  %v377_v63 = vsel %vm376_vm7, %v244_v58, %v237_v57  ;;  %v1917_v35 = vld [vmem:[#allocation8 + $0x38] sm:$0xff]   ;;  %v1921_v43 = vld [vmem:[#allocation8 + $0x28] sm:$0xff]  }
 0x19c   :  { %v385_v1 = vsel %vm376_vm7, %v373_v60, %v366_v59  ;;  %v2160_v2 = vpack.c.bf16 %v377_v63, %v377_v63  ;;  %v1897_v38 = vld [vmem:[#allocation7 + $0x1cc] ss:$16 sps:$4 sm:$0xff]   ;;  %v1895_v40 = vld [vmem:[#allocation7 + $0x1c8] ss:$16 sps:$4 sm:$0xff]   ;;  %v1926_v59 = vld [vmem:[#allocation8 + $0x50] sm:$0xff]  }
 0x19d   :  { %1021 = vmatprep.mubr.bf16.mxu1 %v388_v61  ;;  %v2162_v4 = vpack.c.bf16 %v385_v1, %v385_v1  ;;  %v1900_v42 = vld [vmem:[#allocation7 + $0x1ac] ss:$16 sps:$4 sm:$0xff]   ;;  %v1898_v44 = vld [vmem:[#allocation7 + $0x1a8] ss:$16 sps:$4 sm:$0xff]   ;;  %v1927_v60 = vld [vmem:[#allocation8 + $0x10] sm:$0xff]  }
 0x19e   :  { %1022 = vmatmul.mubr.bf16.vlgmr.msra.gmra.mxu1 %v2160_v2  ;;  %v1903_v46 = vld [vmem:[#allocation7 + $0x18c] ss:$16 sps:$4 sm:$0xff]   ;;  %v1901_v48 = vld [vmem:[#allocation7 + $0x188] ss:$16 sps:$4 sm:$0xff]   ;;  %v1930_v63 = vld [vmem:[#allocation8 + $0x40] sm:$0xff]  }
 0x19f   :  { %1113 = vmatpush1.bf16.msra.mxu1 %v1844_v62  ;;  %1063 = vmatmul.mubr.bf16.vlgmr.msra.gmra.mxu0 %v2162_v4  ;;  %v1924_v49 = vld [vmem:[#allocation8 + $0x58] sm:$0xff]   ;;  %v1929_v62 = vld [vmem:[#allocation8 + $0x8] sm:$0xff]   ;;  %v1931_v1 = vld [vmem:[#allocation8] sm:$0xff]  }
 0x1a0   :  { %1072 = vmatpush1.bf16.msra.mxu0 %v1847_v3  ;;  %1103 = vmatprep.mubr.bf16.mxu0 %v388_v61  ;;  %v1906_v50 = vld [vmem:[#allocation7 + $0x16c] ss:$16 sps:$4 sm:$0xff]   ;;  %v1904_v52 = vld [vmem:[#allocation7 + $0x168] ss:$16 sps:$4 sm:$0xff]  }
 0x1a1   :  { %1114 = vmatprep.subr.bf16.mxu1 %v1852_v5  ;;  %1073 = vmatprep.subr.bf16.mxu0 %v1855_v6  ;;  %v1925_v51 = vld [vmem:[#allocation8 + $0x18] sm:$0xff]   ;;  %v1928_v61 = vld [vmem:[#allocation8 + $0x48] sm:$0xff]   ;;  %v1934_v5 = vld [vmem:[#allocation8 + $0xf0] sm:$0xff]  }
 0x1a2   :  { %1144 = vmatprep.mubr.bf16.mxu1 %v2068_v0  ;;  %v1871_v0 = vld [vmem:[#allocation7 + $0x68] ss:$16 sps:$4 sm:$0xff]   ;;  %v1909_v53 = vld [vmem:[#allocation7 + $0x14c] ss:$16 sps:$4 sm:$0xff]   ;;  %v1935_v6 = vld [vmem:[#allocation8 + $0xb0] sm:$0xff]  }
 0x1a3   :  { %1115 = vmatpush1.bf16.msra.mxu1 %v1850_v7  ;;  %v1907_v54 = vld [vmem:[#allocation7 + $0x148] ss:$16 sps:$4 sm:$0xff]   ;;  %v1912_v55 = vld [vmem:[#allocation7 + $0x12c] ss:$16 sps:$4 sm:$0xff]  }
 0x1a4   :  { %1074 = vmatpush1.bf16.msra.mxu0 %v1853_v8  ;;  %1116 = vmatprep.subr.bf16.mxu1 %v1858_v9  ;;  %v1910_v56 = vld [vmem:[#allocation7 + $0x128] ss:$16 sps:$4 sm:$0xff]   ;;  %v1915_v57 = vld [vmem:[#allocation7 + $0x10c] ss:$16 sps:$4 sm:$0xff]   ;;  %v1938_v8 = vld [vmem:[#allocation8 + $0xe0] sm:$0xff]  }
 0x1a5   :  { %1075 = vmatprep.subr.bf16.mxu0 %v1861_v10  ;;  %v1913_v58 = vld [vmem:[#allocation7 + $0x108] ss:$16 sps:$4 sm:$0xff]   ;;  %v1939_v9 = vld [vmem:[#allocation8 + $0xa0] sm:$0xff]  }
 0x1a6   :  { %v1932_v3 = vld [vmem:[#allocation8 + $0xf8] sm:$0xff]   ;;  %v1937_v7 = vld [vmem:[#allocation8 + $0xa8] sm:$0xff]  }
 0x1a7   :  { %1117 = vmatpush1.bf16.msra.mxu1 %v1856_v11  ;;  %v1940_v10 = vld [vmem:[#allocation8 + $0xd8] sm:$0xff]  }
 0x1a8   :  { %1076 = vmatpush1.bf16.msra.mxu0 %v1859_v12  ;;  %1118 = vmatprep.subr.bf16.mxu1 %v1864_v13  ;;  %v1941_v11 = vld [vmem:[#allocation8 + $0x98] sm:$0xff]   ;;  %v1942_v12 = vld [vmem:[#allocation8 + $0xd0] sm:$0xff]  }
 0x1a9   :  { %1077 = vmatprep.subr.bf16.mxu0 %v1867_v14  ;;  %v1943_v13 = vld [vmem:[#allocation8 + $0x90] sm:$0xff]   ;;  %v1944_v14 = vld [vmem:[#allocation8 + $0xc8] sm:$0xff]  }
 0x1ab   :  { %1119 = vmatpush1.bf16.msra.mxu1 %v1862_v15  ;;  %v1945_v15 = vld [vmem:[#allocation8 + $0x88] sm:$0xff]  }
 0x1ac   :  { %1078 = vmatpush1.bf16.msra.mxu0 %v1865_v16  ;;  %1120 = vmatprep.subr.bf16.mxu1 %v1870_v17  ;;  %v1946_v16 = vld [vmem:[#allocation8 + $0xc0] sm:$0xff]  }
 0x1ad   :  { %1079 = vmatprep.subr.bf16.mxu0 %v1873_v18  ;;  %v1947_v17 = vld [vmem:[#allocation8 + $0x80] sm:$0xff]   ;;  %v490_v18 = vshrl.u32 %v80_v26, 7 }
 0x1af   :  { %1121 = vmatpush1.bf16.msra.mxu1 %v1868_v19  ;;  %v491_v19 = vsub.s32 0, %v490_v18 }
 0x1b0   :  { %1080 = vmatpush1.bf16.msra.mxu0 %v1871_v0  ;;  %1122 = vmatprep.subr.bf16.mxu1 %v1876_v20  ;;  %v391_v0 = vld [vmem:[#allocation5 + $0x4] ss:$8 sm:$0xf]  ;;  %v495_v20 = vsub.s32 1, %v490_v18 }
 0x1b1   :  { %1081 = vmatprep.subr.bf16.mxu0 %v1879_v21  ;;  %v492_v21 = vrot.slane %v391_v0, %v491_v19 }
 0x1b3   :  { %1123 = vmatpush1.bf16.msra.mxu1 %v1874_v22  ;;  %v496_v22 = vrot.slane %v391_v0, %v495_v20 }
 0x1b4   :  { %1082 = vmatpush1.bf16.msra.mxu0 %v1877_v23  ;;  %1124 = vmatprep.subr.bf16.mxu1 %v1882_v24 }
 0x1b5   :  { %1083 = vmatprep.subr.bf16.mxu0 %v1885_v25 }
 0x1b7   :  { %1125 = vmatpush1.bf16.msra.mxu1 %v1880_v27 }
 0x1b8   :  { %1084 = vmatpush1.bf16.msra.mxu0 %v1883_v28  ;;  %1126 = vmatprep.subr.bf16.mxu1 %v1888_v29 }
 0x1b9   :  { %1085 = vmatprep.subr.bf16.mxu0 %v1891_v30 }
 0x1bb   :  { %1127 = vmatpush1.bf16.msra.mxu1 %v1886_v31 }
 0x1bc   :  { %1086 = vmatpush1.bf16.msra.mxu0 %v1889_v32  ;;  %1686 = vmatprep.subr.bf16.mxu1 %v1916_v33 }
 0x1bd   :  { %1087 = vmatprep.subr.bf16.mxu0 %v1894_v34 }
 0x1be   :  { %1145 = vmatmul.mubr.bf16.vlgmr.msra.gmra.mxu1 %v2162_v4  ;;  %v1933_v4 = vld [vmem:[#allocation8 + $0xb8] sm:$0xff]  }
 0x1bf   :  { %1687 = vmatpush3.bf16.msra.mxu1 %v1917_v35 }
 0x1c0   :  { %1088 = vmatpush2.bf16.msra.mxu0 %v1892_v36  ;;  %1688 = vmatprep.subr.bf16.mxu1 %v1918_v37 }
 0x1c1   :  { %1089 = vmatprep.subr.bf16.mxu0 %v1897_v38 }
 0x1c3   :  { %1689 = vmatpush3.bf16.msra.mxu1 %v1919_v39 }
 0x1c4   :  { %1090 = vmatpush2.bf16.msra.mxu0 %v1895_v40  ;;  %1690 = vmatprep.subr.bf16.mxu1 %v1920_v41 }
 0x1c5   :  { %1091 = vmatprep.subr.bf16.mxu0 %v1900_v42 }
 0x1c7   :  { %1691 = vmatpush3.bf16.msra.mxu1 %v1921_v43  ;;  %v499_v43 = vsub.s32 2, %v490_v18 }
 0x1c8   :  { %1092 = vmatpush2.bf16.msra.mxu0 %v1898_v44  ;;  %1692 = vmatprep.subr.bf16.mxu1 %v1922_v45  ;;  %v503_v44 = vsub.s32 3, %v490_v18 }
 0x1c9   :  { %1093 = vmatprep.subr.bf16.mxu0 %v1903_v46  ;;  %v500_v45 = vrot.slane %v391_v0, %v499_v43 }
 0x1ca   :  { %v504_v46 = vrot.slane %v391_v0, %v503_v44 }
 0x1cb   :  { %1693 = vmatpush3.bf16.msra.mxu1 %v1923_v47 }
 0x1cc   :  { %1094 = vmatpush2.bf16.msra.mxu0 %v1901_v48  ;;  %1694 = vmatprep.subr.bf16.mxu1 %v1924_v49 }
 0x1cd   :  { %1095 = vmatprep.subr.bf16.mxu0 %v1906_v50 }
 0x1cf   :  { %1695 = vmatpush3.bf16.msra.mxu1 %v1925_v51 }
 0x1d0   :  { %1096 = vmatpush2.bf16.msra.mxu0 %v1904_v52  ;;  %1696 = vmatprep.subr.bf16.mxu1 %v1926_v59 }
 0x1d1   :  { %1097 = vmatprep.subr.bf16.mxu0 %v1909_v53 }
 0x1d3   :  { %1697 = vmatpush3.bf16.msra.mxu1 %v1927_v60 }
 0x1d4   :  { %1098 = vmatpush2.bf16.msra.mxu0 %v1907_v54  ;;  %1698 = vmatprep.subr.bf16.mxu1 %v1928_v61 }
 0x1d5   :  { %1099 = vmatprep.subr.bf16.mxu0 %v1912_v55 }
 0x1d7   :  { %1699 = vmatpush3.bf16.msra.mxu1 %v1929_v62 }
 0x1d8   :  { %1100 = vmatpush2.bf16.msra.mxu0 %v1910_v56  ;;  %1700 = vmatprep.subr.bf16.mxu1 %v1930_v63 }
 0x1d9   :  { %1101 = vmatprep.subr.bf16.mxu0 %v1915_v57 }
 0x1db   :  { %1701 = vmatpush3.bf16.msra.mxu1 %v1931_v1  ;;  %v1157_v1 = vld [vmem:[#allocation5 + $0x5] ss:$0 sm:$0xff] }
 0x1dc   :  { %1102 = vmatpush2.bf16.msra.mxu0 %v1913_v58 }
 0x1dd   :  { %1708 = vmatprep.subr.bf16.mxu0 %v1932_v3 }
 0x1df   :  { %1104 = vmatmul.mubr.bf16.vlgmr.msra.gmra.mxu0 %v2160_v2  ;;  %v1936_v2 = vld [vmem:[#allocation8 + $0xe8] sm:$0xff]  }
 0x1e0   :  { %1709 = vmatpush3.bf16.msra.mxu0 %v1933_v4 }
 0x1e1   :  { %1710 = vmatprep.subr.bf16.mxu0 %v1934_v5 }
 0x1e4   :  { %1711 = vmatpush3.bf16.msra.mxu0 %v1935_v6 }
 0x1e5   :  { %1712 = vmatprep.subr.bf16.mxu0 %v1936_v2 }
 0x1e8   :  { %1713 = vmatpush3.bf16.msra.mxu0 %v1937_v7 }
 0x1e9   :  { %1714 = vmatprep.subr.bf16.mxu0 %v1938_v8 }
 0x1ec   :  { %1715 = vmatpush3.bf16.msra.mxu0 %v1939_v9 }
 0x1ed   :  { %1716 = vmatprep.subr.bf16.mxu0 %v1940_v10 }
 0x1f0   :  { %1717 = vmatpush3.bf16.msra.mxu0 %v1941_v11 }
 0x1f1   :  { %1718 = vmatprep.subr.bf16.mxu0 %v1942_v12 }
 0x1f4   :  { %1719 = vmatpush3.bf16.msra.mxu0 %v1943_v13 }
 0x1f5   :  { %1720 = vmatprep.subr.bf16.mxu0 %v1944_v14 }
 0x1f8   :  { %1721 = vmatpush3.bf16.msra.mxu0 %v1945_v15 }
 0x1f9   :  { %1722 = vmatprep.subr.bf16.mxu0 %v1946_v16 }
 0x1fc   :  { %1723 = vmatpush3.bf16.msra.mxu0 %v1947_v17 }
 0x25e   :  { %v1023_v23 = vpop.f32.mrf.mxu1 }
 0x25f   :  { %v1024_v24 = vadd.f32 %v1023_v23, %v492_v21  ;;  %v1064_v25 = vpop.f32.mrf.mxu0 }
 0x260   :  { %v1025_v27 = vpop.f32.mrf.mxu1 }
 0x261   :  { %v1065_v28 = vadd.f32 %v1064_v25, %v1024_v24  ;;  %v1026_v29 = vadd.f32 %v1025_v27, %v496_v22  ;;  %v1066_v30 = vpop.f32.mrf.mxu0 }
 0x262   :  { %v1027_v31 = vpop.f32.mrf.mxu1 }
 0x263   :  { %v1067_v32 = vadd.f32 %v1066_v30, %v1026_v29  ;;  %v1068_v33 = vpop.f32.mrf.mxu0  ;;  %v1153_v34 = vmax.f32 %v1065_v28, 0.0 }
 0x264   :  { %v1028_v35 = vpop.f32.mrf.mxu1 }
 0x265   :  { %v1154_v36 = vmax.f32 %v1067_v32, 0.0  ;;  %v1069_v37 = vpop.f32.mrf.mxu0  ;;  %v1158_v38 = vpack.c.bf16 %v1153_v34, %v1153_v34 }
 0x267   :  { %v1159_v26 = vpack.c.bf16 %v1154_v36, %v1154_v36 }
 0x269   :  { %1450 = vmatprep.mubr.bf16.mxu1 %v1159_v26 }
 0x26a   :  { %1451 = vmatmul.mubr.bf16.vlgmr.msra.gmra.mxu1 %v1158_v38 }
 0x27e   :  { %v1146_v39 = vpop.f32.mrf.mxu1 }
 0x280   :  { %v1148_v40 = vpop.f32.mrf.mxu1 }
 0x282   :  { %v1150_v41 = vpop.f32.mrf.mxu1 }
 0x284   :  { %v1151_v42 = vpop.f32.mrf.mxu1 }
 0x29f   :  { %v1105_v47 = vpop.f32.mrf.mxu0 }
 0x2a0   :  { %v1106_v48 = vadd.f32 %v1105_v47, %v500_v45 }
 0x2a1   :  { %v1107_v49 = vpop.f32.mrf.mxu0 }
 0x2a2   :  { %v1147_v50 = vadd.f32 %v1146_v39, %v1106_v48  ;;  %v1108_v51 = vadd.f32 %v1107_v49, %v504_v46 }
 0x2a3   :  { %v1109_v52 = vpop.f32.mrf.mxu0 }
 0x2a4   :  { %v1149_v53 = vadd.f32 %v1148_v40, %v1108_v51  ;;  %v1155_v54 = vmax.f32 %v1147_v50, 0.0 }
 0x2a5   :  { %v1110_v55 = vpop.f32.mrf.mxu0 }
 0x2a6   :  { %v1156_v56 = vmax.f32 %v1149_v53, 0.0  ;;  %v1160_v58 = vpack.c.bf16 %v1155_v54, %v1155_v54 }
 0x2a8   :  { %v1161_v57 = vpack.c.bf16 %v1156_v56, %v1156_v56 }
 0x2aa   :  { %1490 = vmatprep.mubr.bf16.mxu0 %v1161_v57 }
 0x2ab   :  { %1491 = vmatmul.mubr.bf16.vlgmr.msra.gmra.mxu0 %v1160_v58 }
 0x32a   :  { %v1702_v59 = vpop.f32.mrf.mxu1 }
 0x32c   :  { %v1703_v60 = vpop.f32.mrf.mxu1 }
 0x32d   :  { %v1704_v63 = vadd.f32 %v1703_v60, %v1702_v59 }
 0x32e   :  { %v1705_v61 = vpop.f32.mrf.mxu1 }
 0x32f   :  { %v1453_v5 = vadd.f32 %v1704_v63, %v1157_v1 }
 0x330   :  { %v1706_v62 = vpop.f32.mrf.mxu1 }
 0x36b   :  { %v1724_v3 = vpop.f32.mrf.mxu0 }
 0x36d   :  { %v1725_v4 = vpop.f32.mrf.mxu0 }
 0x36e   :  { %v1726_v6 = vadd.f32 %v1725_v4, %v1724_v3 }
 0x36f   :  { %v1727_v2 = vpop.f32.mrf.mxu0 }
 0x370   :  { %v1493_v7 = vadd.f32 %v1726_v6, %v1453_v5 }
 0x371   :  { %v1728_v8 = vpop.f32.mrf.mxu0 }
 0x372   :  { %v1499_v9 = vsel %vm1498_vm8, %v1493_v7, -inf }
 0x373   :  { %1500 = vmax.xlane.f32.xlu1 %v1499_v9 }
 0x3fc   :  { %v1501_v10 = vpop.xlane.xlu1 %1500 }
 0x3fd   :  { %v1502_v11 = vsub.f32 %v1493_v7, %v1501_v10 }
 0x3ff   :  { %v1503_v12 = vmul.f32 1.442695, %v1502_v11 }
 0x401   :  { %1948 = vpow2.f32 %v1503_v12 }
 0x40e   :  { %v1949_v13 = vpop.eup %1948 }
 0x40f   :  { %v1505_v14 = vsel %vm1498_vm8, %v1949_v13, 0.0 }
 0x410   :  { %1506 = vadd.xlane.f32.xlu1 %v1505_v14 }
 0x499   :  { %v1507_v15 = vpop.xlane.xlu1 %1506 }
 0x49a   :  { %1950 = vrcp.f32 %v1507_v15 }
 0x4a7   :  { %v1951_v16 = vpop.eup %1950 }
 0x4a8   :  { %v1509_v17 = vmul.f32 %v1951_v16, %v1949_v13 }
 0x4aa   :  { %1510 = vst [vmem:[#allocation10] sm:$0x3] %v1509_v17 }
 0x4ab   :  { %2043 = shalt.err (!%p2040_p10)
}
 0x4ac   :  { %1520 = dma.vmem_to_hbm [thread:$0]  %s1518_s13, 32, %s2179_s6, [#allocation4]  }
 0x4ad   :  { %2058 = dma.done.wait [#allocation4], 32  }
 0x4ae   :  { %2059 = vsyncadd [#allocation4], 4294967264 }
 0x4af   :  { %1524 = vsyncpa [#allocation3], 1 }
 0x4b0   :  { %1525 = vsyncpa [#allocation6], 1 }
 0x4b1   :  { %1526 = vsyncpa [#allocation9], 1 }
 0x4b2   :  { %1527 = vsyncpa [#allocation4], 1 }

</bundles_post_ra>
